<compile_context>
chip_gen: v6e
topology: v6e:2x2x1
jax: 0.10.0
libtpu: 0.0.40
codegen_flags: <defaults>
</compile_context>

<pallas_src>
import numpy as np
import jax
import jax.numpy as jnp
from jax.experimental import pallas as pl
from jax.experimental.pallas import tpu as pltpu


# ------------------------------ helpers ------------------------------------

def round_up(x, m):
    return ((x + m - 1) // m) * m


def _pick_tile(dim, max_tile, granule):
    """Largest tile <= max_tile that divides `dim` (full extent if dim small)."""
    if dim <= max_tile:
        return dim
    for t in range(max_tile, granule - 1, -granule):
        if dim % t == 0:
            return t
    return dim  # full extent is always a legal block


# ----------------------------- Pallas kernel --------------------------------

def _assconv_matmul_kernel(w_ref, p_ref, o_ref, acc_ref):
    """Batched tiled MXU matmul with fp32 accumulator; K is the 3rd grid axis.

    w_ref : (1, Cp, tk)  bf16  per-batch softmax-folded weight (+ bias column)
    p_ref : (1, tk, tp)  bf16  im2col patches (+ ones row), spatial on lanes
    o_ref : (1, Cp, tp)  f32   final AssConv output tile (lane-dense)
    """
    @pl.when(pl.program_id(2) == 0)
    def _init():
        acc_ref[...] = jnp.zeros_like(acc_ref)

    acc_ref[...] += jnp.dot(w_ref[0], p_ref[0],
                            preferred_element_type=jnp.float32)

    @pl.when(pl.program_id(2) == pl.num_programs(2) - 1)
    def _store():
        o_ref[0] = acc_ref[...]


def pallas_assconv_matmul(w_eff, patches):
    """w_eff: (N, Cp, K_pad) bf16, patches: (N, K_pad, P_pad) bf16
    -> (N, Cp, P_pad) f32."""
    N, Cp, K_pad = w_eff.shape
    N2, K2, P_pad = patches.shape
    assert N == N2 and K_pad == K2
    assert K_pad % 128 == 0 and P_pad % 128 == 0 and Cp % 16 == 0

    tk = _pick_tile(K_pad, 512, 128)

    # Spatial (lane) tile: as large as possible while staying within a VMEM
    # budget that is also safe on v7x (64 MiB physical VMEM).
    vmem_budget = 20 * 1024 * 1024
    tp_cap = 2048
    while True:
        tp = _pick_tile(P_pad, tp_cap, 128)
        vmem_est = (2 * Cp * tk * 2          # weight block, double-buffered
                    + 2 * tk * tp * 2        # patch block, double-buffered
                    + 2 * Cp * tp * 4        # output block, double-buffered
                    + Cp * tp * 4)           # fp32 accumulator scratch
        if vmem_est <= vmem_budget or tp <= 128:
            break
        tp_cap = max(128, tp_cap // 2)

    grid = (N, P_pad // tp, K_pad // tk)
    flops = 2 * N * Cp * K_pad * P_pad
    bytes_accessed = N * (Cp * K_pad * 2 + K_pad * P_pad * 2 + Cp * P_pad * 4)

    return pl.pallas_call(
        _assconv_matmul_kernel,
        grid=grid,
        in_specs=[pl.BlockSpec((1, Cp, tk), lambda n, p, kk: (n, 0, kk)),
                  pl.BlockSpec((1, tk, tp), lambda n, p, kk: (n, kk, p))],
        out_specs=pl.BlockSpec((1, Cp, tp), lambda n, p, kk: (n, 0, p)),
        out_shape=jax.ShapeDtypeStruct((N, Cp, P_pad), jnp.float32),
        scratch_shapes=[pltpu.VMEM((Cp, tp), jnp.float32)],
        compiler_params=pltpu.CompilerParams(
            dimension_semantics=("parallel", "parallel", "arbitrary"),
            vmem_limit_bytes=40 * 1024 * 1024),
        cost_estimate=pl.CostEstimate(flops=flops, transcendentals=0,
                                      bytes_accessed=bytes_accessed),
    )(w_eff, patches)


# ------------------------------ JAX glue ------------------------------------

def im2col_batched(x, k, stride, pad, K_pad, P_pad):
    """x: (N,C,H,W) -> bf16 patches (N, K_pad, P_pad).

    Row C*k*k is all ones (bias row); remaining K rows and trailing spatial
    lanes are zero padding (128-alignment)."""
    N, C, H, W = x.shape
    xp = jnp.pad(x, ((0, 0), (0, 0), (pad, pad), (pad, pad)))
    Ho = (H + 2 * pad - k) // stride + 1
    Wo = (W + 2 * pad - k) // stride + 1
    cols = []
    for i in range(k):
        for j in range(k):
            cols.append(xp[:, :, i:i + stride * Ho:stride, j:j + stride * Wo:stride])
    p = jnp.stack(cols, axis=2).reshape(N, C * k * k, Ho * Wo)   # ci-major, i, j
    ones = jnp.ones((N, 1, Ho * Wo), p.dtype)
    p = jnp.concatenate([p, ones], axis=1)                       # bias row
    p = jnp.pad(p, ((0, 0), (0, K_pad - (C * k * k + 1)), (0, P_pad - Ho * Wo)))
    return p.astype(jnp.bfloat16)


def expand_group_weight(w, groups, c_in):
    """Grouped weight (C_out, C_in/g, kh, kw) -> block-diagonal dense."""
    c_out, cin_g, kh, kw = w.shape
    cout_g = c_out // groups
    full = jnp.zeros((c_out, c_in, kh, kw), w.dtype)
    for g in range(groups):
        full = full.at[g * cout_g:(g + 1) * cout_g,
                       g * cin_g:(g + 1) * cin_g].set(w[g * cout_g:(g + 1) * cout_g])
    return full


def embed_ver(w, k):
    """(C_out, C_in_g, 3, 1) -> (C_out, C_in_g, k, k); matches (c+1, c) padding."""
    c_out, c_in_g = w.shape[0], w.shape[1]
    m = k // 2
    full = jnp.zeros((c_out, c_in_g, k, k), w.dtype)
    return full.at[:, :, m - 1:m + 2, m].set(w[:, :, :, 0])


def embed_hor(w, k):
    """(C_out, C_in_g, 1, 3) -> (C_out, C_in_g, k, k); matches (c, c+1) padding."""
    c_out, c_in_g = w.shape[0], w.shape[1]
    m = k // 2
    full = jnp.zeros((c_out, c_in_g, k, k), w.dtype)
    return full.at[:, :, m, m - 1:m + 2].set(w[:, :, 0, :])


def bn_fold(bn_params, eps=1e-5):
    gamma, beta, mean, var = bn_params
    scale = gamma / jnp.sqrt(var + eps)
    bias = beta - mean * scale
    return scale, bias


# --------------------------- AssConv forward --------------------------------

def init_params(key, c_in, c_out, k, groups):
    g_groups = 8 if (groups == 1 and c_in >= 8) else groups
    hidden = max(c_in // 4, 3)
    L = 4 if k > 1 else 3
    ks = jax.random.split(key, 16)

    def conv_w(kk, shape):
        return 0.1 * jax.random.normal(kk, shape, jnp.float32)

    def bn_p(kk):
        a, b, c, d = jax.random.split(kk, 4)
        gamma = 1.0 + 0.1 * jax.random.normal(a, (c_out,), jnp.float32)
        beta = 0.1 * jax.random.normal(b, (c_out,), jnp.float32)
        mean = 0.1 * jax.random.normal(c, (c_out,), jnp.float32)
        var = jax.random.uniform(d, (c_out,), jnp.float32, minval=0.5, maxval=1.5)
        return gamma, beta, mean, var

    p = {
        'ori_w': conv_w(ks[0], (c_out, c_in // groups, k, k)),
        'new_w': conv_w(ks[1], (c_out, c_in // groups, k, k)),
        'grp_w': conv_w(ks[2], (c_out, c_in // g_groups, k, k)),
        'ori_bn': bn_p(ks[3]), 'new_bn': bn_p(ks[4]), 'grp_bn': bn_p(ks[5]),
        'fc1_w': 0.1 * jax.random.normal(ks[10], (hidden, c_in), jnp.float32),
        'fc1_b': 0.1 * jax.random.normal(ks[11], (hidden,), jnp.float32),
        'fc2_w': 0.1 * jax.random.normal(ks[12], (L, hidden), jnp.float32),
        'fc2_b': 0.1 * jax.random.normal(ks[13], (L,), jnp.float32),
    }
    if k > 1:
        p['ver_w'] = conv_w(ks[6], (c_out, c_in // groups, 3, 1))
        p['hor_w'] = conv_w(ks[7], (c_out, c_in // groups, 1, 3))
        p['ver_bn'] = bn_p(ks[8])
        p['hor_bn'] = bn_p(ks[9])
    return p


def assconv_forward(params, x, k, stride, padding, groups):
    N, c_in, H, W = x.shape
    c_out = params['ori_w'].shape[0]
    g_groups = 8 if (groups == 1 and c_in >= 8) else groups

    # ---- per-branch weights: densify groups, embed 3x1/1x3, fold BN scale ---
    dense, biases = [], []

    def add_branch(w, g, bn):
        wd = expand_group_weight(w, g, c_in) if g > 1 else w
        sc, bi = bn_fold(bn)
        dense.append(wd * sc[:, None, None, None])   # BN scale folded into weight
        biases.append(bi)

    add_branch(params['ori_w'], groups, params['ori_bn'])
    add_branch(params['new_w'], groups, params['new_bn'])
    add_branch(params['grp_w'], g_groups, params['grp_bn'])
    slot_of_branch = [0, 1, 2]
    if k > 1:
        center = padding - k // 2
        assert center >= 0, "TODO(synk): CropLayer path not implemented"
        assert k % 2 == 1, "TODO(synk): even-k AC embedding not implemented"
        add_branch(embed_ver(params['ver_w'], k), groups, params['ver_bn'])
        add_branch(embed_hor(params['hor_w'], k), groups, params['hor_bn'])
        slot_of_branch += [3, 3]   # ACBlock = ver + hor, share 4th softmax slot

    Kd = c_in * k * k
    W_all = jnp.stack([w.reshape(c_out, Kd) for w in dense], axis=0)   # (S, C_out, Kd)
    bias_all = jnp.stack(biases, axis=0)                               # (S, C_out)

    # ---- attention head (tiny, plain JAX): GAP -> fc -> softmax ------------
    gap = jnp.mean(x, axis=(2, 3))                                     # (N, C_in)
    h = jax.nn.relu(gap @ params['fc1_w'].T + params['fc1_b'])
    wsm = jax.nn.softmax(h @ params['fc2_w'].T + params['fc2_b'], axis=1)
    w_slots = wsm[:, jnp.array(slot_of_branch)]                        # (N, S)

    # ---- fold softmax branch weighting into per-batch effective weights ----
    w_eff = jnp.einsum('ns,sck->nck', w_slots, W_all)                  # (N, C_out, Kd)
    b_eff = w_slots @ bias_all                                         # (N, C_out)
    w_aug = jnp.concatenate([w_eff, b_eff[:, :, None]], axis=2)        # bias column

    K_aug = Kd + 1
    K_pad = round_up(K_aug, 128)         # MXU-aligned contraction dim
    Cp = round_up(c_out, 16)             # bf16 sublane-aligned output rows
    w_aug = jnp.pad(w_aug, ((0, 0), (0, Cp - c_out), (0, K_pad - K_aug)))
    w_aug = w_aug.astype(jnp.bfloat16)

    # ---- one batched, tiled bf16 MXU matmul producing the FINAL output -----
    Ho = (H + 2 * padding - k) // stride + 1
    Wo = (W + 2 * padding - k) // stride + 1
    P = Ho * Wo
    P_pad = round_up(P, 128)
    patches = im2col_batched(x, k, stride, padding, K_pad, P_pad)      # (N,K_pad,P_pad)

    out = pallas_assconv_matmul(w_aug, patches)                        # (N, Cp, P_pad) f32
    return out[:, :c_out, :P].reshape(N, c_out, Ho, Wo)


# -------------------------- pure-JAX reference ------------------------------

def reference_forward(params, x, k, stride, padding, groups):
    def conv(xx, w, s, ph, pw, g):
        return jax.lax.conv_general_dilated(
            xx, w, (s, s), ((ph, ph), (pw, pw)),
            dimension_numbers=('NCHW', 'OIHW', 'NCHW'),
            feature_group_count=g, precision=jax.lax.Precision.HIGHEST)

    def bn(y, p, eps=1e-5):
        g_, b_, m_, v_ = p
        return ((y - m_[None, :, None, None])
                * (g_ / jnp.sqrt(v_ + eps))[None, :, None, None]
                + b_[None, :, None, None])

    N, c_in, H, W = x.shape
    g_groups = 8 if (groups == 1 and c_in >= 8) else groups
    branches = [bn(conv(x, params['ori_w'], stride, padding, padding, groups), params['ori_bn']),
                bn(conv(x, params['new_w'], stride, padding, padding, groups), params['new_bn']),
                bn(conv(x, params['grp_w'], stride, padding, padding, g_groups), params['grp_bn'])]
    if k > 1:
        center = padding - k // 2
        ac = (bn(conv(x, params['ver_w'], stride, center + 1, center, groups), params['ver_bn'])
              + bn(conv(x, params['hor_w'], stride, center, center + 1, groups), params['hor_bn']))
        branches.append(ac)
    all_out = jnp.stack(branches, axis=1)                      # (N, L, C_out, Ho, Wo)
    gap = x.mean(axis=-1).mean(axis=-1)
    h = jax.nn.relu(gap @ params['fc1_w'].T + params['fc1_b'])
    w = jax.nn.softmax(h @ params['fc2_w'].T + params['fc2_b'], axis=1)
    return (w[:, :, None, None, None] * all_out).sum(axis=1)


# --------------------------------- main --------------------------------------

if __name__ == "__main__":
    key = jax.random.PRNGKey(0)
    k_x, k_p = jax.random.split(key)

    N, C_in, H, W = 2, 8, 16, 16
    C_out, K, STRIDE, PAD, GROUPS = 8, 3, 1, 1, 1

    x = jax.random.normal(k_x, (N, C_in, H, W), jnp.float32)
    params = init_params(k_p, C_in, C_out, K, GROUPS)

    out = jax.block_until_ready(assconv_forward(params, x, K, STRIDE, PAD, GROUPS))
    ref = jax.block_until_ready(reference_forward(params, x, K, STRIDE, PAD, GROUPS))
    assert out.shape == ref.shape == (N, C_out, H, W), (out.shape, ref.shape)

    # bf16 MXU operands with fp32 accumulation vs an exact fp32 reference:
    # validate at bf16-appropriate tolerance.
    np.testing.assert_allclose(np.asarray(out), np.asarray(ref), rtol=1e-2, atol=1e-2)

    print("KERNEL_OK")
</pallas_src>

<mosaic_0001>
module attributes {stable_mosaic.version = 11 : i64} {
  func.func @_assconv_matmul_kernel(%arg0: i32, %arg1: i32, %arg2: i32, %arg3: memref<1x16x128xbf16, #tpu.memory_space<vmem>>, %arg4: memref<1x128x256xbf16, #tpu.memory_space<vmem>>, %arg5: memref<1x16x256xf32, #tpu.memory_space<vmem>>, %arg6: memref<16x256xf32, #tpu.memory_space<vmem>>) attributes {dimension_semantics = [#tpu.dimension_semantics<parallel>, #tpu.dimension_semantics<parallel>, #tpu.dimension_semantics<arbitrary>], iteration_bounds = array<i64: 2, 1, 1>, scalar_prefetch = 0 : i64, scratch_operands = 1 : i64, tpu.core_type = #tpu.core_type<tc>, window_params = [{transform_indices = @transform_0, window_bounds = array<i64: 1, 16, 128>}, {transform_indices = @transform_1, window_bounds = array<i64: 1, 128, 256>}, {transform_indices = @transform_2, window_bounds = array<i64: 1, 16, 256>}]} {
    %c0_i32 = arith.constant 0 : i32
    %0 = arith.cmpi eq, %arg2, %c0_i32 : i32
    %1 = arith.extui %0 : i1 to i32
    %c0_i32_0 = arith.constant 0 : i32
    %2 = arith.cmpi ne, %1, %c0_i32_0 : i32
    scf.if %2 {
      %cst_12 = arith.constant 0.000000e+00 : f32
      %14 = vector.broadcast %cst_12 : f32 to vector<16x256xf32>
      %c0_13 = arith.constant 0 : index
      %c0_14 = arith.constant 0 : index
      %15 = vector.load %arg6[%c0_13, %c0_14] : memref<16x256xf32, #tpu.memory_space<vmem>>, vector<16x256xf32>
      tpu.vector_store %arg6[%c0_13, %c0_14], %14 {strides = array<i32>} : memref<16x256xf32, #tpu.memory_space<vmem>>, vector<16x256xf32>,
    } else {
    }
    %c0 = arith.constant 0 : index
    %c0_1 = arith.constant 0 : index
    %3 = vector.load %arg6[%c0, %c0_1] : memref<16x256xf32, #tpu.memory_space<vmem>>, vector<16x256xf32>
    %c0_2 = arith.constant 0 : index
    %c0_3 = arith.constant 0 : index
    %c0_4 = arith.constant 0 : index
    %4 = vector.load %arg3[%c0_2, %c0_3, %c0_4] : memref<1x16x128xbf16, #tpu.memory_space<vmem>>, vector<1x16x128xbf16>
    %5 = vector.shape_cast %4 : vector<1x16x128xbf16> to vector<16x128xbf16>
    %c0_5 = arith.constant 0 : index
    %c0_6 = arith.constant 0 : index
    %c0_7 = arith.constant 0 : index
    %6 = vector.load %arg4[%c0_5, %c0_6, %c0_7] : memref<1x128x256xbf16, #tpu.memory_space<vmem>>, vector<1x128x256xbf16>
    %7 = vector.shape_cast %6 : vector<1x128x256xbf16> to vector<128x256xbf16>
    %cst = arith.constant dense<0.000000e+00> : vector<16x256xf32>
    %8 = tpu.matmul %5, %7, %cst {dimension_numbers = #tpu.dot_dimension_numbers<[1], [0], [0], [1], [0, 0, 1, 1], [], []>} : vector<16x128xbf16>, vector<128x256xbf16>, vector<16x256xf32> -> vector<16x256xf32>
    %9 = arith.addf %3, %8 : vector<16x256xf32>
    %c0_8 = arith.constant 0 : index
    %c0_9 = arith.constant 0 : index
    %10 = vector.load %arg6[%c0_8, %c0_9] : memref<16x256xf32, #tpu.memory_space<vmem>>, vector<16x256xf32>
    tpu.vector_store %arg6[%c0_8, %c0_9], %9 {strides = array<i32>} : memref<16x256xf32, #tpu.memory_space<vmem>>, vector<16x256xf32>,
    %c0_i32_10 = arith.constant 0 : i32
    %11 = arith.cmpi eq, %arg2, %c0_i32_10 : i32
    %12 = arith.extui %11 : i1 to i32
    %c0_i32_11 = arith.constant 0 : i32
    %13 = arith.cmpi ne, %12, %c0_i32_11 : i32
    scf.if %13 {
      %c0_12 = arith.constant 0 : index
      %c0_13 = arith.constant 0 : index
      %14 = vector.load %arg6[%c0_12, %c0_13] : memref<16x256xf32, #tpu.memory_space<vmem>>, vector<16x256xf32>
      %c0_14 = arith.constant 0 : index
      %c0_15 = arith.constant 0 : index
      %c0_16 = arith.constant 0 : index
      %15 = vector.load %arg5[%c0_14, %c0_15, %c0_16] : memref<1x16x256xf32, #tpu.memory_space<vmem>>, vector<1x16x256xf32>
      %16 = vector.shape_cast %15 : vector<1x16x256xf32> to vector<16x256xf32>
      %17 = vector.shape_cast %14 : vector<16x256xf32> to vector<1x16x256xf32>
      tpu.vector_store %arg5[%c0_14, %c0_15, %c0_16], %17 {strides = array<i32>} : memref<1x16x256xf32, #tpu.memory_space<vmem>>, vector<1x16x256xf32>,
    } else {
    }
    return
  }
  func.func @transform_0(%arg0: i32, %arg1: i32, %arg2: i32) -> (i32, i32, i32) {
    %c0_i32 = arith.constant 0 : i32
    %c0_i32_0 = arith.constant 0 : i32
    return %arg0, %c0_i32, %arg2 : i32, i32, i32
  }
  func.func @transform_1(%arg0: i32, %arg1: i32, %arg2: i32) -> (i32, i32, i32) {
    %c0_i32 = arith.constant 0 : i32
    return %arg0, %arg2, %arg1 : i32, i32, i32
  }
  func.func @transform_2(%arg0: i32, %arg1: i32, %arg2: i32) -> (i32, i32, i32) {
    %c0_i32 = arith.constant 0 : i32
    %c0_i32_0 = arith.constant 0 : i32
    return %arg0, %c0_i32, %arg1 : i32, i32, i32
  }
}

</mosaic_0001>

<bundles_post_ra>
// kernel: tpu_custom_call.1
= control target key start
LH: loop header
LB: loop body
LE: loop exit
PB: predicated region body
PF: predicated region fallthrough
CT: control target
= control target key end

     0   :  { %7 = vsyncpa [#allocation4], 0  ;;  %s1053_s0 = inlined_call_operand.hbm [shape: bf16[2,16,128], index: 0, kind: input, shape index: {}]   ;;  %s1054_s1 = inlined_call_operand.hbm [shape: bf16[2,128,256], index: 1, kind: input, shape index: {}]   ;;  %s1055_s2 = inlined_call_operand.hbm [shape: f32[2,16,256], index: 2, kind: output, shape index: {}]  }
   0x1   :  { %9 = vsyncpa [#allocation4 + $0x1], 0 }
   0x2   :  { %10 = vsyncpa [#allocation7], 0 }
   0x3   :  { %12 = vsyncpa [#allocation7 + $0x1], 0 }
   0x4   :  { %13 = vsyncpa [#allocation5], 0 }
   0x5   :  { %15 = vsyncpa [#allocation5 + $0x1], 0  ;;  %s855_s9 = smov 0   ;;  %s857_s10 = smov 0  }
   0x6   :  { %s859_s11 = smov 0   ;;  %s861_s12 = smov 0  }
   0x7   :  { %s863_s13 = smov 0   ;;  %s865_s14 = smov 0  }
   0x8 LB: > { %s550_s15 = sadd.s32 4294967295, %s828_s14   ;;  %s551_s16 = sadd.s32 4294967294, %s828_s14   ;;  %s828_s14 = sphi %s865_s14, %s21_s14   ;;  %s824_s13 = sphi %s863_s13, %s1066_s13   ;;  %s820_s12 = sphi %s861_s12, %s1065_s12   ;;  %s816_s11 = sphi %s859_s11, %s1064_s11   ;;  %s812_s10 = sphi %s857_s10, %s1063_s10   ;;  %s808_s9 = sphi %s855_s9, %s1062_s9  }
   0x9   : > { %s40_s17 = sadd.s32 1, %s824_s13  ;;  %s49_s18 = sadd.s32 1, %s816_s11 }
   0xa   : > { %p42_p0 = scmp.ge.s32.totalorder %s40_s17, 2  ;;  %p56_p1 = scmp.ne.s32.totalorder %s816_s11, %s812_s10 }
   0xb   : > { %p57_p2 = scmp.eq.s32.totalorder %s828_s14, 0  ;;  %p62_p3 = scmp.ne.s32.totalorder %s812_s10, %s808_s9 }
   0xc   : > { %s1068_s17 = smov (%p42_p0, %s40_s17), 0  ;;  %p63_p5 = scmp.eq.s32.totalorder %s550_s15, 0 }
   0xd   : > { %p896_p4 = por %p57_p2, %p56_p1  ;;  %s44_s20 = ssub.s32 %s824_s13, %s1068_s17 }
   0xe   : > { %p118_p6 = scmp.eq.s32.totalorder %s550_s15, 1  ;;  %p47_p7 = scmp.eq.s32.totalorder %s44_s20, 0 }
   0xf   : > { %p902_p8 = por %p63_p5, %p62_p3  ;;  %p124_p10 = scmp.eq.s32.totalorder %s551_s16, 1 }
  0x10   : > { %p906_p9 = por %p118_p6, %p56_p1  ;;  %p553_p12 = scmp.ge.s32.totalorder %s828_s14, 2 }
  0x11   : > { %s911_s23 = scalar_select %p47_p7, %s816_s11, %s49_s18  }
  0x12   : > { %p913_p11 = por %p124_p10, %p62_p3  ;;  %p606_p13 = scmp.lt.s32.totalorder %s828_s14, 2 }
  0x13   : > { %s920_s25 = sand.u32 1, %s816_s11   ;;  %s586_s27 = sshll.u32 %s824_s13, 7 }
  0x14   : > { %s554_s26 = sshll.u32 %s920_s25, 3  ;;  %s155_s30 = scalar_lea.hbm %s1053_s0, %s586_s27 }
  0x15   : > { %s148_s3 = scalar_lea.vmem [#allocation3], %s554_s26  ;;  %p929_p0 = pnand %p606_p13, %p896_p4 }
  0x16   : > { %s156_s4 = sshll.u32 %s148_s3, 4  ;;  %p560_p1 = scmp.ge.s32.totalorder %s828_s14, 1  ;;  %s157_s4 = int_to_ptr.vmem [resolvable:$true] %s156_s4 }
  0x17   : > { %s145_s6 = scalar_lea.sflag [#allocation4], %s920_s25  ;;  %p690_p2 = pneg %p929_p0 }
  0x18   : > { %s701_s7 = scalar_lea.vmem %s157_s4, 128  ;;  %s830_s8 = smov [#allocation3]  }
  0x19   : > { %p702_p3 = scmp.ne.s32.totalorder %s157_s4, %s701_s7  ;;  %s706_s15 = sshll.u32 %s830_s8, 4  ;;  %s707_s15 = int_to_ptr.vmem [resolvable:$false] %s706_s15 }
  0x1a   : > { %s708_s16 = scalar_lea.vmem %s707_s15, 256  ;;  %p709_p4 = scmp.lt.s32.totalorder %s157_s4, %s707_s15 }
  0x1b   : > { %p704_p5 = pnand %p702_p3, %p690_p2  ;;  %p710_p7 = scmp.lt.s32.totalorder %s708_s16, %s701_s7 }
  0x1d   : > { %p705_p6 = pneg %p704_p5  ;;  %p711_p10 = por %p710_p7, %p709_p4 }
  0x1f   : > { %p712_p13 = pnand %p711_p10, %p705_p6 }
  0x21   : > { %715 = shalt.err (!%p712_p13)
}
  0x22   : > { %s831_s18 = smov 64   ;;  %s832_s19 = smov 4  }
  0x23   : > { %598 = dma.hbm_to_vmem [thread:$0]  (!%p929_p0), %s155_s30, 128, %s157_s4, %s145_s6, %s831_s18, %s831_s18, %s832_s19  }
  0x24   : > { %p190_p3 = scmp.lt.s32.totalorder %s828_s14, 3  ;;  %s557_s20 = sshll.u32 %s920_s25, 7 }
  0x25   : > { %s587_s26 = sshll.u32 %s824_s13, 11  ;;  %s170_s7 = scalar_lea.vmem [#allocation6], %s557_s20 }
  0x26   : > { %p947_p5 = pnand %p560_p1, %p190_p3  ;;  %s181_s3 = scalar_lea.hbm %s1054_s1, %s587_s26 }
  0x27   : > { %s182_s8 = sshll.u32 %s170_s7, 4  ;;  %s167_s15 = scalar_lea.sflag [#allocation7], %s920_s25  ;;  %s183_s8 = int_to_ptr.vmem [resolvable:$true] %s182_s8 }
  0x28   : > { %s729_s16 = scalar_lea.vmem %s183_s8, 2048  ;;  %s833_s30 = smov [#allocation6]  }
  0x29   : > { %p730_p6 = scmp.ne.s32.totalorder %s183_s8, %s729_s16  ;;  %s734_s4 = sshll.u32 %s833_s30, 4  ;;  %s735_s4 = int_to_ptr.vmem [resolvable:$false] %s734_s4 }
  0x2a   : > { %s736_s6 = scalar_lea.vmem %s735_s4, 4096  ;;  %p737_p1 = scmp.lt.s32.totalorder %s183_s8, %s735_s4 }
  0x2b   : > { %p732_p4 = pnand %p730_p6, %p690_p2  ;;  %p738_p10 = scmp.lt.s32.totalorder %s736_s6, %s729_s16 }
  0x2d   : > { %p733_p7 = pneg %p732_p4  ;;  %p739_p13 = por %p738_p10, %p737_p1 }
  0x2f   : > { %p740_p3 = pnand %p739_p13, %p733_p7 }
  0x31   : > { %743 = shalt.err (!%p740_p3)
}
  0x32   : > { %s834_s18 = smov 128   ;;  %s835_s19 = smov 8  }
  0x33   : > { %601 = dma.hbm_to_vmem [thread:$0]  (!%p929_p0), %s181_s3, 2048, %s183_s8, %s167_s15, %s834_s18, %s834_s18, %s835_s19  }
  0x34   : > { %194 = sbr.rel (%p947_p5) target bundleno = 307 (0x133), region = 28  ;;  %s963_s25 = sand.u32 (!%p947_p5), 1, %s812_s10  }
  0x35   : > { %s561_s20 = sshll.u32 (!%p947_p5), %s963_s25, 3  ;;  %s197_s26 = scalar_lea.sflag (!%p947_p5), [#allocation4], %s963_s25 }
  0x36   : > { %s967_s28 = scalar_lea.vmem (!%p947_p5), [#allocation3], %s561_s20 }
  0x39   : > { %795 = dma.done.wait (%p902_p8), %s197_s26, 128  }
  0x3a   : > { %797 = vsyncadd (%p902_p8), %s197_s26, 4294967168  ;;  %s562_s5 = sshll.u32 %s963_s25, 7  ;;  %s206_s27 = scalar_lea.sflag [#allocation7], %s963_s25 }
  0x3b   : > { %s975_s29 = scalar_lea.vmem [#allocation6], %s562_s5 }
  0x3c   : > { %799 = dma.done.wait (%p902_p8), %s206_s27, 2048  }
  0x3d   : > { %801 = vsyncadd (%p902_p8), %s206_s27, 4294965248  ;;  %v836_v0 = vmov 0   ;;  %v663_v1 = vld [vmem:[%s975_s29 + $0x74] ss:$8 sps:$4 sm:$0xff]   ;;  %v665_v2 = vld [vmem:[%s975_s29 + $0x70] ss:$8 sps:$4 sm:$0xff]  }
  0x3e   : > { %387 = vmatprep.mubr.bf16.mxu0 %v836_v0  ;;  %355 = vmatprep.subr.bf16.mxu0 %v663_v1  ;;  %v666_v3 = vld [vmem:[%s975_s29 + $0x64] ss:$8 sps:$4 sm:$0xff]   ;;  %v668_v4 = vld [vmem:[%s975_s29 + $0x60] ss:$8 sps:$4 sm:$0xff]   ;;  %v669_v5 = vld [vmem:[%s975_s29 + $0x54] ss:$8 sps:$4 sm:$0xff]  }
  0x3f   : > { %356 = vmatpush1.bf16.msra.mxu0 %v665_v2  ;;  %v671_v6 = vld [vmem:[%s975_s29 + $0x50] ss:$8 sps:$4 sm:$0xff]   ;;  %v672_v7 = vld [vmem:[%s975_s29 + $0x44] ss:$8 sps:$4 sm:$0xff]   ;;  %v674_v8 = vld [vmem:[%s975_s29 + $0x40] ss:$8 sps:$4 sm:$0xff]  }
  0x40   : > { %357 = vmatprep.subr.bf16.mxu0 %v666_v3  ;;  %v675_v9 = vld [vmem:[%s975_s29 + $0x34] ss:$8 sps:$4 sm:$0xff]   ;;  %v677_v10 = vld [vmem:[%s975_s29 + $0x30] ss:$8 sps:$4 sm:$0xff]   ;;  %v678_v11 = vld [vmem:[%s975_s29 + $0x24] ss:$8 sps:$4 sm:$0xff]  }
  0x41   : > { %v680_v12 = vld [vmem:[%s975_s29 + $0x20] ss:$8 sps:$4 sm:$0xff]   ;;  %v681_v13 = vld [vmem:[%s975_s29 + $0x14] ss:$8 sps:$4 sm:$0xff]   ;;  %v683_v14 = vld [vmem:[%s975_s29 + $0x10] ss:$8 sps:$4 sm:$0xff]  }
  0x42   : > { %v684_v15 = vld [vmem:[%s975_s29 + $0x4] ss:$8 sps:$4 sm:$0xff]   ;;  %v686_v16 = vld [vmem:[%s975_s29] ss:$8 sps:$4 sm:$0xff]   ;;  %v687_v17 = vld [vmem:[%s967_s28] sm:$0xff]   ;;  %s563_s21 = sshll.u32 %s963_s25, 5 }
  0x43   : > { %358 = vmatpush1.bf16.msra.mxu0 %v668_v4  ;;  %s234_s3 = scalar_lea.vmem [#allocation8], %s563_s21  ;;  %s588_s8 = sshll.u32 %s820_s12, 9 }
  0x44   : > { %359 = vmatprep.subr.bf16.mxu0 %v669_v5  ;;  %s433_s7 = sshll.u32 %s234_s3, 4  ;;  %s1005_s30 = scalar_lea.hbm %s1055_s2, %s588_s8  ;;  %s1000_s7 = int_to_ptr.vmem [resolvable:$true] %s433_s7 }
  0x45   : > { %s418_s4 = scalar_lea.sflag [#allocation5], %s963_s25  ;;  %s744_s6 = scalar_lea.vmem %s1000_s7, 512 }
  0x46   : > { %p745_p8 = scmp.ne.s32.totalorder %s1000_s7, %s744_s6  ;;  %s837_s12 = smov [#allocation8]  }
  0x47   : > { %360 = vmatpush1.bf16.msra.mxu0 %v671_v6  ;;  %s748_s18 = sshll.u32 %s837_s12, 4  ;;  %s749_s18 = int_to_ptr.vmem [resolvable:$false] %s748_s18 }
  0x48   : > { %361 = vmatprep.subr.bf16.mxu0 %v672_v7  ;;  %p746_p0 = pnand %p745_p8, %p906_p9  ;;  %s750_s19 = scalar_lea.vmem %s749_s18, 1024 }
  0x49   : > { %p751_p5 = scmp.lt.s32.totalorder %s1000_s7, %s749_s18  ;;  %p752_p6 = scmp.lt.s32.totalorder %s750_s19, %s744_s6 }
  0x4a   : > { %p747_p2 = pneg %p746_p0 }
  0x4b   : > { %362 = vmatpush1.bf16.msra.mxu0 %v674_v8  ;;  %p753_p4 = por %p752_p6, %p751_p5 }
  0x4c   : > { %363 = vmatprep.subr.bf16.mxu0 %v675_v9 }
  0x4d   : > { %p754_p7 = pnand %p753_p4, %p747_p2 }
  0x4f   : > { %364 = vmatpush1.bf16.msra.mxu0 %v677_v10 }
  0x50   : > { %365 = vmatprep.subr.bf16.mxu0 %v678_v11 }
  0x53   : > { %366 = vmatpush1.bf16.msra.mxu0 %v680_v12 }
  0x54   : > { %367 = vmatprep.subr.bf16.mxu0 %v681_v13 }
  0x57   : > { %368 = vmatpush1.bf16.msra.mxu0 %v683_v14 }
  0x58   : > { %369 = vmatprep.subr.bf16.mxu0 %v684_v15 }
  0x5b   : > { %370 = vmatpush1.bf16.msra.mxu0 %v686_v16 }
  0x5e   : > { %388 = vmatmul.mubr.bf16.vlgmr.msra.gmra.mxu0 %v687_v17 }
 0x11e   : > { %v389_v18 = vpop.f32.mrf.mxu0 }
 0x11f   : > { %413 = vst [vmem:[%s234_s3] sm:$0xff] %v389_v18 }
 0x120   : > { %v391_v19 = vpop.f32.mrf.mxu0 }
 0x121   : > { %414 = vst [vmem:[%s234_s3 + $0x8] sm:$0xff] %v391_v19 }
 0x122   : > { %v393_v20 = vpop.f32.mrf.mxu0 }
 0x123   : > { %415 = vst [vmem:[%s234_s3 + $0x10] sm:$0xff] %v393_v20 }
 0x124   : > { %v395_v21 = vpop.f32.mrf.mxu0 }
 0x125   : > { %416 = vst [vmem:[%s234_s3 + $0x18] sm:$0xff] %v395_v21 }
 0x126   : > { %757 = shalt.err (!%p754_p7)
}
 0x127   : > { %s758_s20 = scalar_lea.hbm %s1005_s30, 512  ;;  %s762_s5 = scalar_lea.hbm %s1055_s2, 1024 }
 0x128   : > { %p759_p1 = scmp.ne.s32.totalorder %s1005_s30, %s758_s20  ;;  %p763_p3 = scmp.lt.s32.totalorder %s1005_s30, %s1055_s2 }
 0x129   : > { %p764_p8 = scmp.lt.s32.totalorder %s762_s5, %s758_s20 }
 0x12a   : > { %p760_p10 = pnand %p759_p1, %p906_p9 }
 0x12b   : > { %p765_p0 = por %p764_p8, %p763_p3 }
 0x12c   : > { %p761_p13 = pneg %p760_p10 }
 0x12e   : > { %p766_p2 = pnand %p765_p0, %p761_p13 }
 0x130   : > { %769 = shalt.err (!%p766_p2)
}
 0x131   : > { %s838_s21 = smov 256   ;;  %s839_s3 = smov 16  }
 0x132   : > { %593 = dma.vmem_to_hbm [thread:$0]  (%p906_p9), %s1000_s7, 512, %s1005_s30, %s418_s4, %s838_s21, %s838_s21, %s839_s3  }
 0x133 PF: > { %s448_s8 = sand.u32 1, %s808_s9   ;;  %p603_p5 = pnand %p553_p12, %p913_p11 }
 0x134   : > { %s449_s15 = scalar_lea.sflag [#allocation5], %s448_s8 }
 0x135   : > { %p604_p6 = pneg %p603_p5 }
 0x137   : > { %803 = dma.done.wait (%p604_p6), %s449_s15, 512  }
 0x138   : > { %805 = vsyncadd (%p604_p6), %s449_s15, 4294966784  ;;  %s21_s14 = sadd.s32 1, %s828_s14   ;;  %s1062_s9 = smov %s812_s10 }
 0x139   : > { %p18_p4 = scmp.ge.s32.totalorder %s21_s14, 4   ;;  %s1063_s10 = smov %s816_s11 }
 0x13a   : > { %s1064_s11 = smov %s911_s23  ;;  %s1065_s12 = smov %s824_s13 }
 0x13b   : > { %s1066_s13 = smov %s1068_s17  ;;  %20 = sbr.rel (!%p18_p4) target bundleno = 8 (0x8), region = 94 }
 0x140   :  { %454 = vsyncpa [#allocation4], 1 }
 0x141   :  { %456 = vsyncpa [#allocation4 + $0x1], 1 }
 0x142   :  { %457 = vsyncpa [#allocation7], 1 }
 0x143   :  { %459 = vsyncpa [#allocation7 + $0x1], 1 }
 0x144   :  { %460 = vsyncpa [#allocation5], 1 }
 0x145   :  { %462 = vsyncpa [#allocation5 + $0x1], 1 }

</bundles_post_ra>
